<compile_context>
chip_gen: v7x
topology: tpu7x:2x2x1
jax: 0.10.0
libtpu: 0.0.40
codegen_flags: <defaults>
</compile_context>

<pallas_src>
import functools

import jax
import jax.numpy as jnp
from jax.experimental import pallas as pl
from jax.experimental.pallas import tpu as pltpu

MIN_VAL = 0.46075920000743864
MAX_VAL = 0.8271828066825867


def clamp_kernel(x_ref, o_ref):
    # clamp_min then clamp_max, exactly matching torch.clamp_min/clamp_max.
    v1 = jnp.maximum(x_ref[...], jnp.float32(MIN_VAL))
    o_ref[...] = jnp.minimum(v1, jnp.float32(MAX_VAL))


@functools.partial(jax.jit, donate_argnums=(0,))
def model_forward(x1):
    # x1: (N, C, H, W) float32, passed in native layout (no relayout copies).
    # Full-array VMEM block: exempt from the (8,128) divisibility rule and the
    # whole tensor (12 KiB) trivially fits VMEM on v5e/v6e/v7x.
    return pl.pallas_call(
        clamp_kernel,
        out_shape=jax.ShapeDtypeStruct(x1.shape, x1.dtype),
        in_specs=[pl.BlockSpec(memory_space=pltpu.MemorySpace.VMEM)],
        out_specs=pl.BlockSpec(memory_space=pltpu.MemorySpace.VMEM),
        input_output_aliases={0: 0},  # output reuses the (donated) input buffer
    )(x1)


if __name__ == "__main__":
    key = jax.random.PRNGKey(0)
    x1 = jax.random.normal(key, (1, 1, 64, 48), dtype=jnp.float32)

    # Pure-JAX reference, computed BEFORE the kernel call (x1 is donated).
    ref = jnp.minimum(jnp.maximum(x1, jnp.float32(MIN_VAL)), jnp.float32(MAX_VAL))
    ref = jax.block_until_ready(ref)
    in_shape, in_dtype = x1.shape, x1.dtype

    out = model_forward(x1)
    out = jax.block_until_ready(out)

    assert out.shape == in_shape and out.dtype == in_dtype
    assert jnp.array_equal(out, ref)
    print("KERNEL_OK")
</pallas_src>

<mosaic_0001>
module attributes {stable_mosaic.version = 11 : i64} {
  func.func @clamp_kernel(%arg0: memref<1x1x64x48xf32, #tpu.memory_space<vmem>>, %arg1: memref<1x1x64x48xf32, #tpu.memory_space<vmem>>) attributes {dimension_semantics = [], scalar_prefetch = 0 : i64, scratch_operands = 0 : i64, tpu.core_type = #tpu.core_type<tc>} {
    %c0 = arith.constant 0 : index
    %c0_0 = arith.constant 0 : index
    %c0_1 = arith.constant 0 : index
    %c0_2 = arith.constant 0 : index
    %0 = vector.load %arg0[%c0, %c0_0, %c0_1, %c0_2] : memref<1x1x64x48xf32, #tpu.memory_space<vmem>>, vector<1x1x64x48xf32>
    %cst = arith.constant 0.460759193 : f32
    %1 = vector.broadcast %cst : f32 to vector<1x1x64x48xf32>
    %2 = arith.maximumf %0, %1 : vector<1x1x64x48xf32>
    %cst_3 = arith.constant 0.827182829 : f32
    %3 = vector.broadcast %cst_3 : f32 to vector<1x1x64x48xf32>
    %4 = arith.minimumf %2, %3 : vector<1x1x64x48xf32>
    %c0_4 = arith.constant 0 : index
    %c0_5 = arith.constant 0 : index
    %c0_6 = arith.constant 0 : index
    %c0_7 = arith.constant 0 : index
    %5 = vector.load %arg1[%c0_4, %c0_5, %c0_6, %c0_7] : memref<1x1x64x48xf32, #tpu.memory_space<vmem>>, vector<1x1x64x48xf32>
    tpu.vector_store %arg1[%c0_4, %c0_5, %c0_6, %c0_7], %4 {strides = array<i32>} : memref<1x1x64x48xf32, #tpu.memory_space<vmem>>, vector<1x1x64x48xf32>,
    return
  }
}

</mosaic_0001>

<bundles_post_ra>
// kernel: model_forward.1
= control target key start
LH: loop header
LB: loop body
LE: loop exit
PB: predicated region body
PF: predicated region fallthrough
CT: control target
= control target key end

     0   :  { %vm32_vm0 = vcmask 392192   ;;  %s111_s0 = inlined_call_operand.vmem [shape: f32[1,1,64,48], index: 0, kind: input, shape index: {}, may-alias: {0,1}]   ;;  %s112_s1 = inlined_call_operand.vmem [shape: f32[1,1,64,48], index: 1, kind: output, shape index: {}, may-alias: {0,1}]  }
   0x1   :  { %v8_v0 = vld [vmem:[%s111_s0] sm:$0xff]  ;;  %v9_v1 = vld [vmem:[%s111_s0 + $0x8] sm:$0xff]  ;;  %v10_v2 = vld [vmem:[%s111_s0 + $0x10] sm:$0xff] }
   0x2   :  { %v16_v3 = vmax.f32 %v8_v0, 0.4607592  ;;  %v17_v4 = vmax.f32 %v9_v1, 0.4607592  ;;  %v18_v5 = vmax.f32 %v10_v2, 0.4607592 }
   0x3   :  { %v11_v6 = vld [vmem:[%s111_s0 + $0x18] sm:$0xff]  ;;  %v12_v7 = vld [vmem:[%s111_s0 + $0x20] sm:$0xff]  ;;  %v13_v8 = vld [vmem:[%s111_s0 + $0x28] sm:$0xff] }
   0x4   :  { %v24_v9 = vmin.f32 %v16_v3, 0.8271828  ;;  %v25_v10 = vmin.f32 %v17_v4, 0.8271828  ;;  %v26_v11 = vmin.f32 %v18_v5, 0.8271828 }
   0x5   :  { %v19_v12 = vmax.f32 %v11_v6, 0.4607592  ;;  %v20_v13 = vmax.f32 %v12_v7, 0.4607592  ;;  %v21_v14 = vmax.f32 %v13_v8, 0.4607592 }
   0x6   :  { %33 = vst.msk [vmem:[%s112_s1] sm:$0xff] %vm32_vm0, %v24_v9  ;;  %34 = vst.msk [vmem:[%s112_s1 + $0x8] sm:$0xff] %vm32_vm0, %v25_v10 }
   0x7   :  { %35 = vst.msk [vmem:[%s112_s1 + $0x10] sm:$0xff] %vm32_vm0, %v26_v11  ;;  %v27_v17 = vmin.f32 %v19_v12, 0.8271828  ;;  %v28_v18 = vmin.f32 %v20_v13, 0.8271828 }
   0x8   :  { %v29_v19 = vmin.f32 %v21_v14, 0.8271828 }
   0xe   :  { %v14_v15 = vld [vmem:[%s111_s0 + $0x30] sm:$0xff]  ;;  %v15_v16 = vld [vmem:[%s111_s0 + $0x38] sm:$0xff] }
   0xf   :  { %v22_v20 = vmax.f32 %v14_v15, 0.4607592  ;;  %v23_v21 = vmax.f32 %v15_v16, 0.4607592  ;;  %36 = vst.msk [vmem:[%s112_s1 + $0x18] sm:$0xff] %vm32_vm0, %v27_v17  ;;  %37 = vst.msk [vmem:[%s112_s1 + $0x20] sm:$0xff] %vm32_vm0, %v28_v18 }
  0x10   :  { %38 = vst.msk [vmem:[%s112_s1 + $0x28] sm:$0xff] %vm32_vm0, %v29_v19 }
  0x11   :  { %v30_v22 = vmin.f32 %v22_v20, 0.8271828  ;;  %v31_v23 = vmin.f32 %v23_v21, 0.8271828 }
  0x13   :  { %39 = vst.msk [vmem:[%s112_s1 + $0x30] sm:$0xff] %vm32_vm0, %v30_v22  ;;  %40 = vst.msk [vmem:[%s112_s1 + $0x38] sm:$0xff] %vm32_vm0, %v31_v23 }

</bundles_post_ra>
